<compile_context>
chip_gen: v5e
topology: v5e:2x2
jax: 0.10.0
libtpu: 0.0.40
codegen_flags: <defaults>
</compile_context>

<pallas_src>
import functools

import jax
import jax.numpy as jnp
from jax.experimental import pallas as pl
from jax.experimental.pallas import tpu as pltpu

_EPS = 1e-12


# ----------------------------- fused Pallas kernel -----------------------------

def _l2norm_nodes(h):
    # F.normalize(h, p=2, dim=node_axis, eps=1e-12) for per-graph h of shape (N, H):
    # h / max(||h||_col, eps) == h * rsqrt(max(||h||_col^2, eps^2)).
    s = jnp.sum(h * h, axis=0, keepdims=True)
    return h * jax.lax.rsqrt(jnp.maximum(s, _EPS * _EPS))


def _critic_kernel(nf_ref, a_ref, fc1w_ref, fc1b_ref, wgl_ref, bsum_ref,
                   fc2w_ref, fc2b_ref, svw_ref, svb_ref, o_ref,
                   *, num_layers, h1):
    """Whole Critic forward for one graph of the batch (grid axis = batch)."""
    x = nf_ref[0]                     # (N, F)   node features of this graph
    a = a_ref[0]                      # (N, N)   per-graph normalized adjacency A_hat

    # fc1 + F.normalize over nodes
    h = jnp.dot(x, fc1w_ref[...], preferred_element_type=jnp.float32) + fc1b_ref[...]
    h = _l2norm_nodes(h)              # (N, H1)

    # GCN layers: GraphConv(norm='both') + linear skip.
    # Weights are concatenated as [Wg | Wl] -> one matmul, then split.
    for l in range(num_layers):
        hw = jnp.dot(h, wgl_ref[l], preferred_element_type=jnp.float32)   # (N, 2*H1)
        y = (jnp.dot(a, hw[:, :h1], preferred_element_type=jnp.float32)   # A_hat @ (h Wg)
             + hw[:, h1:]                                                 # h Wl
             + bsum_ref[l])                                               # bg + bl
        if l < num_layers - 1:
            y = jnp.maximum(y, 0.0)   # gcn_activation = relu (last layer: none)
        h = _l2norm_nodes(y)

    # graph_embed == 'virtual': last node of the graph
    g = h[-1:, :]                                                          # (1, H1)

    # fc2 + re_activation(tanh); dropout(p=0) is identity
    h3 = jnp.tanh(jnp.dot(g, fc2w_ref[...], preferred_element_type=jnp.float32)
                  + fc2b_ref[...])                                         # (1, H2)
    v = jnp.dot(h3, svw_ref[...], preferred_element_type=jnp.float32) + svb_ref[...]
    o_ref[...] = v.reshape(1, 1, 1)


def _full_spec(arr):
    zeros = (0,) * arr.ndim
    return pl.BlockSpec(arr.shape, lambda i, _z=zeros: _z)


def _batch_spec(arr):
    return pl.BlockSpec((1,) + arr.shape[1:], lambda i: (i, 0, 0))


def critic_forward(params, a_bat, node_features):
    """Fused Pallas Critic.forward for 3-D node_features (B, N, F) and
    batched per-graph adjacency a_bat (B, N, N)."""
    b, n, _ = node_features.shape
    h1 = params["fc1_w"].shape[1]
    num_layers = len(params["gcn_w"])

    # Stack per-layer weights: [Wg | Wl] -> (L, H1, 2*H1); bg + bl -> (L, 1, H1)
    wgl = jnp.stack([jnp.concatenate([params["gcn_w"][l], params["lin_w"][l]], axis=1)
                     for l in range(num_layers)])
    bsum = jnp.stack([params["gcn_b"][l] + params["lin_b"][l]
                      for l in range(num_layers)])

    out = pl.pallas_call(
        functools.partial(_critic_kernel, num_layers=num_layers, h1=h1),
        out_shape=jax.ShapeDtypeStruct((b, 1, 1), jnp.float32),
        grid=(b,),
        in_specs=[
            _batch_spec(node_features),
            _batch_spec(a_bat),
            _full_spec(params["fc1_w"]), _full_spec(params["fc1_b"]),
            _full_spec(wgl), _full_spec(bsum),
            _full_spec(params["fc2_w"]), _full_spec(params["fc2_b"]),
            _full_spec(params["sv_w"]), _full_spec(params["sv_b"]),
        ],
        out_specs=pl.BlockSpec((1, 1, 1), lambda i: (i, 0, 0)),
        compiler_params=pltpu.CompilerParams(
            dimension_semantics=("parallel",)),
    )(node_features, a_bat, params["fc1_w"], params["fc1_b"], wgl, bsum,
      params["fc2_w"], params["fc2_b"], params["sv_w"], params["sv_b"])
    return out.reshape(b, 1)


# ----------------------------- pure-JAX reference -----------------------------

def critic_forward_ref(params, a_bat, node_features):
    def nrm(h):  # normalize along node axis (dim=1) per (batch, feature)
        d = jnp.maximum(jnp.sqrt(jnp.sum(h * h, axis=1, keepdims=True)), _EPS)
        return h / d

    h = node_features @ params["fc1_w"] + params["fc1_b"]         # (B, N, H1)
    h = nrm(h)
    num_layers = len(params["gcn_w"])
    for l in range(num_layers):
        gcn = jnp.einsum("bij,bjf->bif", a_bat, h @ params["gcn_w"][l]) + params["gcn_b"][l]
        skip = h @ params["lin_w"][l] + params["lin_b"][l]
        y = gcn + skip
        if l < num_layers - 1:
            y = jnp.maximum(y, 0.0)
        h = nrm(y)
    graph_emb = h[:, -1, :]                                       # virtual node
    h3 = jnp.tanh(graph_emb @ params["fc2_w"] + params["fc2_b"])
    return h3 @ params["sv_w"] + params["sv_b"]                   # (B, 1)


# ----------------------------- setup / main -----------------------------

def make_graph(batch_size, num_nodes):
    """Per-graph adjacency: ring + self loops + a 'virtual' last node connected
    to every node.  Returns batched (B, N, N) A_hat with GraphConv(norm='both')
    normalization D_in^{-1/2} A D_out^{-1/2}, degrees clamped at 1 (DGL
    allow_zero_in_degree semantics).  Mathematically identical to the dense
    block-diagonal batched-graph adjacency, but without the zero blocks."""
    n = num_nodes
    a = jnp.zeros((n, n), dtype=jnp.float32)
    idx = jnp.arange(n)
    a = a.at[idx, idx].set(1.0)                       # self loops
    a = a.at[idx, (idx + 1) % n].set(1.0)             # ring ->
    a = a.at[(idx + 1) % n, idx].set(1.0)             # ring <-
    a = a.at[n - 1, :].set(1.0)                       # virtual node sees all
    a = a.at[:, n - 1].set(1.0)                       # all see virtual node
    deg_in = jnp.clip(a.sum(axis=1), 1.0, None)
    deg_out = jnp.clip(a.sum(axis=0), 1.0, None)
    a_hat = a / jnp.sqrt(deg_in)[:, None] / jnp.sqrt(deg_out)[None, :]
    return jnp.tile(a_hat[None], (batch_size, 1, 1)).astype(jnp.float32)


def make_params(key, feat_dim, hidden_dim1, hidden_dim2, num_layers):
    keys = jax.random.split(key, 4 + 2 * num_layers)
    orth = jax.nn.initializers.orthogonal
    glorot = jax.nn.initializers.glorot_uniform()
    p = {
        # orthogonal_init(fc1), bias=0
        "fc1_w": orth(scale=1.0)(keys[0], (feat_dim, hidden_dim1), jnp.float32),
        "fc1_b": jnp.zeros((1, hidden_dim1), jnp.float32),
        # orthogonal_init(fc2), bias=0
        "fc2_w": orth(scale=1.0)(keys[1], (hidden_dim1, hidden_dim2), jnp.float32),
        "fc2_b": jnp.zeros((1, hidden_dim2), jnp.float32),
        # orthogonal_init(state_value, gain=0.01), bias=0
        "sv_w": orth(scale=0.01)(keys[2], (hidden_dim2, 1), jnp.float32),
        "sv_b": jnp.zeros((1, 1), jnp.float32),
        "gcn_w": [], "gcn_b": [], "lin_w": [], "lin_b": [],
    }
    for l in range(num_layers):
        p["gcn_w"].append(glorot(keys[3 + 2 * l], (hidden_dim1, hidden_dim1), jnp.float32))
        p["gcn_b"].append(jnp.zeros((1, hidden_dim1), jnp.float32))
        p["lin_w"].append(glorot(keys[4 + 2 * l], (hidden_dim1, hidden_dim1), jnp.float32))
        p["lin_b"].append(jnp.zeros((1, hidden_dim1), jnp.float32))
    return p


if __name__ == "__main__":
    B, N = 2, 8                      # batch of graphs, nodes per graph
    FEAT, H1, H2 = 16, 32, 32        # feat_dim, hidden_dim1, hidden_dim2
    NUM_LAYERS = 3

    key = jax.random.PRNGKey(0)
    k_param, k_x = jax.random.split(key)
    params = make_params(k_param, FEAT, H1, H2, NUM_LAYERS)
    a_bat = make_graph(B, N)                                      # (B, N, N)
    node_features = jax.random.normal(k_x, (B, N, FEAT), jnp.float32)

    value = critic_forward(params, a_bat, node_features)
    value = jax.block_until_ready(value)

    ref = critic_forward_ref(params, a_bat, node_features)
    assert value.shape == (B, 1)
    assert jnp.allclose(value, ref, rtol=1e-4, atol=1e-5), (value, ref)

    print("KERNEL_OK")
</pallas_src>

<mosaic_0001>
module attributes {stable_mosaic.version = 11 : i64} {
  func.func @_critic_kernel(%arg0: i32, %arg1: memref<1x8x16xf32, #tpu.memory_space<vmem>>, %arg2: memref<1x8x8xf32, #tpu.memory_space<vmem>>, %arg3: memref<16x32xf32, #tpu.memory_space<vmem>>, %arg4: memref<1x32xf32, #tpu.memory_space<vmem>>, %arg5: memref<3x32x64xf32, #tpu.memory_space<vmem>>, %arg6: memref<3x1x32xf32, #tpu.memory_space<vmem>>, %arg7: memref<32x32xf32, #tpu.memory_space<vmem>>, %arg8: memref<1x32xf32, #tpu.memory_space<vmem>>, %arg9: memref<32x1xf32, #tpu.memory_space<vmem>>, %arg10: memref<1x1xf32, #tpu.memory_space<vmem>>, %arg11: memref<1x1x1xf32, #tpu.memory_space<vmem>>) attributes {dimension_semantics = [#tpu.dimension_semantics<parallel>], iteration_bounds = array<i64: 2>, scalar_prefetch = 0 : i64, scratch_operands = 0 : i64, tpu.core_type = #tpu.core_type<tc>, window_params = [{transform_indices = @transform_0, window_bounds = array<i64: 1, 8, 16>}, {transform_indices = @transform_1, window_bounds = array<i64: 1, 8, 8>}, {pipeline_mode = #tpu.pipeline_mode<synchronous>, transform_indices = @transform_2, window_bounds = array<i64: 16, 32>}, {pipeline_mode = #tpu.pipeline_mode<synchronous>, transform_indices = @transform_3, window_bounds = array<i64: 1, 32>}, {pipeline_mode = #tpu.pipeline_mode<synchronous>, transform_indices = @transform_4, window_bounds = array<i64: 3, 32, 64>}, {pipeline_mode = #tpu.pipeline_mode<synchronous>, transform_indices = @transform_5, window_bounds = array<i64: 3, 1, 32>}, {pipeline_mode = #tpu.pipeline_mode<synchronous>, transform_indices = @transform_6, window_bounds = array<i64: 32, 32>}, {pipeline_mode = #tpu.pipeline_mode<synchronous>, transform_indices = @transform_7, window_bounds = array<i64: 1, 32>}, {pipeline_mode = #tpu.pipeline_mode<synchronous>, transform_indices = @transform_8, window_bounds = array<i64: 32, 1>}, {pipeline_mode = #tpu.pipeline_mode<synchronous>, transform_indices = @transform_9, window_bounds = array<i64: 1, 1>}, {transform_indices = @transform_10, window_bounds = array<i64: 1, 1, 1>}]} {
    %c0 = arith.constant 0 : index
    %c0_0 = arith.constant 0 : index
    %c0_1 = arith.constant 0 : index
    %0 = vector.load %arg1[%c0, %c0_0, %c0_1] : memref<1x8x16xf32, #tpu.memory_space<vmem>>, vector<1x8x16xf32>
    %1 = vector.shape_cast %0 : vector<1x8x16xf32> to vector<8x16xf32>
    %c0_2 = arith.constant 0 : index
    %c0_3 = arith.constant 0 : index
    %c0_4 = arith.constant 0 : index
    %2 = vector.load %arg2[%c0_2, %c0_3, %c0_4] : memref<1x8x8xf32, #tpu.memory_space<vmem>>, vector<1x8x8xf32>
    %3 = vector.shape_cast %2 : vector<1x8x8xf32> to vector<8x8xf32>
    %c0_5 = arith.constant 0 : index
    %c0_6 = arith.constant 0 : index
    %4 = vector.load %arg3[%c0_5, %c0_6] : memref<16x32xf32, #tpu.memory_space<vmem>>, vector<16x32xf32>
    %cst = arith.constant dense<0.000000e+00> : vector<8x32xf32>
    %5 = tpu.matmul %1, %4, %cst {dimension_numbers = #tpu.dot_dimension_numbers<[1], [0], [0], [1], [0, 0, 1, 1], [], []>} : vector<8x16xf32>, vector<16x32xf32>, vector<8x32xf32> -> vector<8x32xf32>
    %c0_7 = arith.constant 0 : index
    %c0_8 = arith.constant 0 : index
    %6 = vector.load %arg4[%c0_7, %c0_8] : memref<1x32xf32, #tpu.memory_space<vmem>>, vector<1x32xf32>
    %7 = vector.broadcast %6 : vector<1x32xf32> to vector<8x32xf32>
    %8 = arith.addf %5, %7 : vector<8x32xf32>
    %9 = arith.mulf %8, %8 : vector<8x32xf32>
    %cst_9 = arith.constant dense<0.000000e+00> : vector<32xf32>
    %10 = vector.multi_reduction <add>, %9, %cst_9 [0] : vector<8x32xf32> to vector<32xf32>
    %11 = vector.shape_cast %10 : vector<32xf32> to vector<1x32xf32>
    %cst_10 = arith.constant 1.000000e-24 : f32
    %12 = vector.broadcast %cst_10 : f32 to vector<1x32xf32>
    %13 = arith.maximumf %11, %12 : vector<1x32xf32>
    %14 = math.rsqrt %13 : vector<1x32xf32>
    %15 = vector.broadcast %14 : vector<1x32xf32> to vector<8x32xf32>
    %16 = arith.mulf %8, %15 : vector<8x32xf32>
    %c0_11 = arith.constant 0 : index
    %c0_12 = arith.constant 0 : index
    %c0_13 = arith.constant 0 : index
    %17 = vector.load %arg5[%c0_11, %c0_12, %c0_13] : memref<3x32x64xf32, #tpu.memory_space<vmem>>, vector<1x32x64xf32>
    %18 = vector.shape_cast %17 : vector<1x32x64xf32> to vector<32x64xf32>
    %cst_14 = arith.constant dense<0.000000e+00> : vector<8x64xf32>
    %19 = tpu.matmul %16, %18, %cst_14 {dimension_numbers = #tpu.dot_dimension_numbers<[1], [0], [0], [1], [0, 0, 1, 1], [], []>} : vector<8x32xf32>, vector<32x64xf32>, vector<8x64xf32> -> vector<8x64xf32>
    %20 = vector.extract_strided_slice %19 {offsets = [0, 0], sizes = [8, 32], strides = [1, 1]} : vector<8x64xf32> to vector<8x32xf32>
    %cst_15 = arith.constant dense<0.000000e+00> : vector<8x32xf32>
    %21 = tpu.matmul %3, %20, %cst_15 {dimension_numbers = #tpu.dot_dimension_numbers<[1], [0], [0], [1], [0, 0, 1, 1], [], []>} : vector<8x8xf32>, vector<8x32xf32>, vector<8x32xf32> -> vector<8x32xf32>
    %22 = vector.extract_strided_slice %19 {offsets = [0, 32], sizes = [8, 32], strides = [1, 1]} : vector<8x64xf32> to vector<8x32xf32>
    %23 = arith.addf %21, %22 : vector<8x32xf32>
    %c0_16 = arith.constant 0 : index
    %c0_17 = arith.constant 0 : index
    %c0_18 = arith.constant 0 : index
    %24 = vector.load %arg6[%c0_16, %c0_17, %c0_18] : memref<3x1x32xf32, #tpu.memory_space<vmem>>, vector<1x1x32xf32>
    %25 = vector.shape_cast %24 : vector<1x1x32xf32> to vector<1x32xf32>
    %26 = vector.broadcast %25 : vector<1x32xf32> to vector<8x32xf32>
    %27 = arith.addf %23, %26 : vector<8x32xf32>
    %cst_19 = arith.constant 0.000000e+00 : f32
    %28 = vector.broadcast %cst_19 : f32 to vector<8x32xf32>
    %29 = arith.maximumf %27, %28 : vector<8x32xf32>
    %30 = arith.mulf %29, %29 : vector<8x32xf32>
    %cst_20 = arith.constant dense<0.000000e+00> : vector<32xf32>
    %31 = vector.multi_reduction <add>, %30, %cst_20 [0] : vector<8x32xf32> to vector<32xf32>
    %32 = vector.shape_cast %31 : vector<32xf32> to vector<1x32xf32>
    %cst_21 = arith.constant 1.000000e-24 : f32
    %33 = vector.broadcast %cst_21 : f32 to vector<1x32xf32>
    %34 = arith.maximumf %32, %33 : vector<1x32xf32>
    %35 = math.rsqrt %34 : vector<1x32xf32>
    %36 = vector.broadcast %35 : vector<1x32xf32> to vector<8x32xf32>
    %37 = arith.mulf %29, %36 : vector<8x32xf32>
    %c1 = arith.constant 1 : index
    %c0_22 = arith.constant 0 : index
    %c0_23 = arith.constant 0 : index
    %38 = vector.load %arg5[%c1, %c0_22, %c0_23] : memref<3x32x64xf32, #tpu.memory_space<vmem>>, vector<1x32x64xf32>
    %39 = vector.shape_cast %38 : vector<1x32x64xf32> to vector<32x64xf32>
    %cst_24 = arith.constant dense<0.000000e+00> : vector<8x64xf32>
    %40 = tpu.matmul %37, %39, %cst_24 {dimension_numbers = #tpu.dot_dimension_numbers<[1], [0], [0], [1], [0, 0, 1, 1], [], []>} : vector<8x32xf32>, vector<32x64xf32>, vector<8x64xf32> -> vector<8x64xf32>
    %41 = vector.extract_strided_slice %40 {offsets = [0, 0], sizes = [8, 32], strides = [1, 1]} : vector<8x64xf32> to vector<8x32xf32>
    %cst_25 = arith.constant dense<0.000000e+00> : vector<8x32xf32>
    %42 = tpu.matmul %3, %41, %cst_25 {dimension_numbers = #tpu.dot_dimension_numbers<[1], [0], [0], [1], [0, 0, 1, 1], [], []>} : vector<8x8xf32>, vector<8x32xf32>, vector<8x32xf32> -> vector<8x32xf32>
    %43 = vector.extract_strided_slice %40 {offsets = [0, 32], sizes = [8, 32], strides = [1, 1]} : vector<8x64xf32> to vector<8x32xf32>
    %44 = arith.addf %42, %43 : vector<8x32xf32>
    %c1_26 = arith.constant 1 : index
    %c0_27 = arith.constant 0 : index
    %c0_28 = arith.constant 0 : index
    %45 = vector.load %arg6[%c1_26, %c0_27, %c0_28] : memref<3x1x32xf32, #tpu.memory_space<vmem>>, vector<1x1x32xf32>
    %46 = vector.shape_cast %45 : vector<1x1x32xf32> to vector<1x32xf32>
    %47 = vector.broadcast %46 : vector<1x32xf32> to vector<8x32xf32>
    %48 = arith.addf %44, %47 : vector<8x32xf32>
    %cst_29 = arith.constant 0.000000e+00 : f32
    %49 = vector.broadcast %cst_29 : f32 to vector<8x32xf32>
    %50 = arith.maximumf %48, %49 : vector<8x32xf32>
    %51 = arith.mulf %50, %50 : vector<8x32xf32>
    %cst_30 = arith.constant dense<0.000000e+00> : vector<32xf32>
    %52 = vector.multi_reduction <add>, %51, %cst_30 [0] : vector<8x32xf32> to vector<32xf32>
    %53 = vector.shape_cast %52 : vector<32xf32> to vector<1x32xf32>
    %cst_31 = arith.constant 1.000000e-24 : f32
    %54 = vector.broadcast %cst_31 : f32 to vector<1x32xf32>
    %55 = arith.maximumf %53, %54 : vector<1x32xf32>
    %56 = math.rsqrt %55 : vector<1x32xf32>
    %57 = vector.broadcast %56 : vector<1x32xf32> to vector<8x32xf32>
    %58 = arith.mulf %50, %57 : vector<8x32xf32>
    %c2 = arith.constant 2 : index
    %c0_32 = arith.constant 0 : index
    %c0_33 = arith.constant 0 : index
    %59 = vector.load %arg5[%c2, %c0_32, %c0_33] : memref<3x32x64xf32, #tpu.memory_space<vmem>>, vector<1x32x64xf32>
    %60 = vector.shape_cast %59 : vector<1x32x64xf32> to vector<32x64xf32>
    %cst_34 = arith.constant dense<0.000000e+00> : vector<8x64xf32>
    %61 = tpu.matmul %58, %60, %cst_34 {dimension_numbers = #tpu.dot_dimension_numbers<[1], [0], [0], [1], [0, 0, 1, 1], [], []>} : vector<8x32xf32>, vector<32x64xf32>, vector<8x64xf32> -> vector<8x64xf32>
    %62 = vector.extract_strided_slice %61 {offsets = [0, 0], sizes = [8, 32], strides = [1, 1]} : vector<8x64xf32> to vector<8x32xf32>
    %cst_35 = arith.constant dense<0.000000e+00> : vector<8x32xf32>
    %63 = tpu.matmul %3, %62, %cst_35 {dimension_numbers = #tpu.dot_dimension_numbers<[1], [0], [0], [1], [0, 0, 1, 1], [], []>} : vector<8x8xf32>, vector<8x32xf32>, vector<8x32xf32> -> vector<8x32xf32>
    %64 = vector.extract_strided_slice %61 {offsets = [0, 32], sizes = [8, 32], strides = [1, 1]} : vector<8x64xf32> to vector<8x32xf32>
    %65 = arith.addf %63, %64 : vector<8x32xf32>
    %c2_36 = arith.constant 2 : index
    %c0_37 = arith.constant 0 : index
    %c0_38 = arith.constant 0 : index
    %66 = vector.load %arg6[%c2_36, %c0_37, %c0_38] : memref<3x1x32xf32, #tpu.memory_space<vmem>>, vector<1x1x32xf32>
    %67 = vector.shape_cast %66 : vector<1x1x32xf32> to vector<1x32xf32>
    %68 = vector.broadcast %67 : vector<1x32xf32> to vector<8x32xf32>
    %69 = arith.addf %65, %68 : vector<8x32xf32>
    %70 = arith.mulf %69, %69 : vector<8x32xf32>
    %cst_39 = arith.constant dense<0.000000e+00> : vector<32xf32>
    %71 = vector.multi_reduction <add>, %70, %cst_39 [0] : vector<8x32xf32> to vector<32xf32>
    %72 = vector.shape_cast %71 : vector<32xf32> to vector<1x32xf32>
    %cst_40 = arith.constant 1.000000e-24 : f32
    %73 = vector.broadcast %cst_40 : f32 to vector<1x32xf32>
    %74 = arith.maximumf %72, %73 : vector<1x32xf32>
    %75 = math.rsqrt %74 : vector<1x32xf32>
    %76 = vector.broadcast %75 : vector<1x32xf32> to vector<8x32xf32>
    %77 = arith.mulf %69, %76 : vector<8x32xf32>
    %78 = vector.extract_strided_slice %77 {offsets = [7, 0], sizes = [1, 32], strides = [1, 1]} : vector<8x32xf32> to vector<1x32xf32>
    %c0_41 = arith.constant 0 : index
    %c0_42 = arith.constant 0 : index
    %79 = vector.load %arg7[%c0_41, %c0_42] : memref<32x32xf32, #tpu.memory_space<vmem>>, vector<32x32xf32>
    %cst_43 = arith.constant dense<0.000000e+00> : vector<1x32xf32>
    %80 = tpu.matmul %78, %79, %cst_43 {dimension_numbers = #tpu.dot_dimension_numbers<[1], [0], [0], [1], [0, 0, 1, 1], [], []>} : vector<1x32xf32>, vector<32x32xf32>, vector<1x32xf32> -> vector<1x32xf32>
    %c0_44 = arith.constant 0 : index
    %c0_45 = arith.constant 0 : index
    %81 = vector.load %arg8[%c0_44, %c0_45] : memref<1x32xf32, #tpu.memory_space<vmem>>, vector<1x32xf32>
    %82 = arith.addf %80, %81 : vector<1x32xf32>
    %83 = math.tanh %82 : vector<1x32xf32>
    %c0_46 = arith.constant 0 : index
    %c0_47 = arith.constant 0 : index
    %84 = vector.load %arg9[%c0_46, %c0_47] : memref<32x1xf32, #tpu.memory_space<vmem>>, vector<32x1xf32>
    %cst_48 = arith.constant dense<0.000000e+00> : vector<1x1xf32>
    %85 = tpu.matmul %83, %84, %cst_48 {dimension_numbers = #tpu.dot_dimension_numbers<[1], [0], [0], [1], [0, 0, 1, 1], [], []>} : vector<1x32xf32>, vector<32x1xf32>, vector<1x1xf32> -> vector<1x1xf32>
    %c0_49 = arith.constant 0 : index
    %c0_50 = arith.constant 0 : index
    %86 = vector.load %arg10[%c0_49, %c0_50] : memref<1x1xf32, #tpu.memory_space<vmem>>, vector<1x1xf32>
    %87 = arith.addf %85, %86 : vector<1x1xf32>
    %88 = vector.shape_cast %87 : vector<1x1xf32> to vector<1x1x1xf32>
    %c0_51 = arith.constant 0 : index
    %c0_52 = arith.constant 0 : index
    %c0_53 = arith.constant 0 : index
    %89 = vector.load %arg11[%c0_51, %c0_52, %c0_53] : memref<1x1x1xf32, #tpu.memory_space<vmem>>, vector<1x1x1xf32>
    tpu.vector_store %arg11[%c0_51, %c0_52, %c0_53], %88 {strides = array<i32>} : memref<1x1x1xf32, #tpu.memory_space<vmem>>, vector<1x1x1xf32>,
    return
  }
  func.func @transform_0(%arg0: i32) -> (i32, i32, i32) {
    %c0_i32 = arith.constant 0 : i32
    %c0_i32_0 = arith.constant 0 : i32
    %c0_i32_1 = arith.constant 0 : i32
    return %arg0, %c0_i32, %c0_i32_0 : i32, i32, i32
  }
  func.func @transform_1(%arg0: i32) -> (i32, i32, i32) {
    %c0_i32 = arith.constant 0 : i32
    %c0_i32_0 = arith.constant 0 : i32
    %c0_i32_1 = arith.constant 0 : i32
    return %arg0, %c0_i32, %c0_i32_0 : i32, i32, i32
  }
  func.func @transform_2(%arg0: i32) -> (i32, i32) {
    %c0_i32 = arith.constant 0 : i32
    %c0_i32_0 = arith.constant 0 : i32
    %c0_i32_1 = arith.constant 0 : i32
    return %c0_i32, %c0_i32_0 : i32, i32
  }
  func.func @transform_3(%arg0: i32) -> (i32, i32) {
    %c0_i32 = arith.constant 0 : i32
    %c0_i32_0 = arith.constant 0 : i32
    %c0_i32_1 = arith.constant 0 : i32
    return %c0_i32, %c0_i32_0 : i32, i32
  }
  func.func @transform_4(%arg0: i32) -> (i32, i32, i32) {
    %c0_i32 = arith.constant 0 : i32
    %c0_i32_0 = arith.constant 0 : i32
    %c0_i32_1 = arith.constant 0 : i32
    %c0_i32_2 = arith.constant 0 : i32
    return %c0_i32, %c0_i32_0, %c0_i32_1 : i32, i32, i32
  }
  func.func @transform_5(%arg0: i32) -> (i32, i32, i32) {
    %c0_i32 = arith.constant 0 : i32
    %c0_i32_0 = arith.constant 0 : i32
    %c0_i32_1 = arith.constant 0 : i32
    %c0_i32_2 = arith.constant 0 : i32
    return %c0_i32, %c0_i32_0, %c0_i32_1 : i32, i32, i32
  }
  func.func @transform_6(%arg0: i32) -> (i32, i32) {
    %c0_i32 = arith.constant 0 : i32
    %c0_i32_0 = arith.constant 0 : i32
    %c0_i32_1 = arith.constant 0 : i32
    return %c0_i32, %c0_i32_0 : i32, i32
  }
  func.func @transform_7(%arg0: i32) -> (i32, i32) {
    %c0_i32 = arith.constant 0 : i32
    %c0_i32_0 = arith.constant 0 : i32
    %c0_i32_1 = arith.constant 0 : i32
    return %c0_i32, %c0_i32_0 : i32, i32
  }
  func.func @transform_8(%arg0: i32) -> (i32, i32) {
    %c0_i32 = arith.constant 0 : i32
    %c0_i32_0 = arith.constant 0 : i32
    %c0_i32_1 = arith.constant 0 : i32
    return %c0_i32, %c0_i32_0 : i32, i32
  }
  func.func @transform_9(%arg0: i32) -> (i32, i32) {
    %c0_i32 = arith.constant 0 : i32
    %c0_i32_0 = arith.constant 0 : i32
    %c0_i32_1 = arith.constant 0 : i32
    return %c0_i32, %c0_i32_0 : i32, i32
  }
  func.func @transform_10(%arg0: i32) -> (i32, i32, i32) {
    %c0_i32 = arith.constant 0 : i32
    %c0_i32_0 = arith.constant 0 : i32
    %c0_i32_1 = arith.constant 0 : i32
    return %arg0, %c0_i32, %c0_i32_0 : i32, i32, i32
  }
}

</mosaic_0001>

<bundles_post_ra>
// kernel: tpu_custom_call.1
= control target key start
LH: loop header
LB: loop body
LE: loop exit
PB: predicated region body
PF: predicated region fallthrough
CT: control target
= control target key end

     0   :  { %s1444_s0 = inlined_call_operand.hbm [shape: f32[2,8,16], index: 0, kind: input, shape index: {}]   ;;  %s1445_s1 = inlined_call_operand.hbm [shape: f32[2,8,8], index: 1, kind: input, shape index: {}]   ;;  %s1446_s2 = inlined_call_operand.hbm [shape: f32[16,32], index: 2, kind: input, shape index: {}]   ;;  %s1447_s3 = inlined_call_operand.vmem [shape: f32[1,32], index: 3, kind: input, shape index: {}]   ;;  %s1448_s4 = inlined_call_operand.hbm [shape: f32[3,32,64], index: 4, kind: input, shape index: {}]   ;;  %s1449_s5 = inlined_call_operand.vmem [shape: f32[3,1,32], index: 5, kind: input, shape index: {}]   ;;  %s1450_s6 = inlined_call_operand.vmem [shape: f32[32,32], index: 6, kind: input, shape index: {}]   ;;  %s1451_s7 = inlined_call_operand.vmem [shape: f32[1,32], index: 7, kind: input, shape index: {}]   ;;  %s1452_s8 = inlined_call_operand.vmem [shape: f32[32,1], index: 8, kind: input, shape index: {}]   ;;  %s1453_s9 = inlined_call_operand.<no memory space> [shape: f32[1,1], index: 9, kind: input, shape index: {}]   ;;  %s1454_s10 = inlined_call_operand.vmem [shape: f32[2,1,1], index: 10, kind: output, shape index: {}]  }
   0x1   :  { %1456 = sst [smem:[#allocation16_spill]] %s1446_s2  ;;  %v15_v0 = vstv %s1453_s9 }
   0x2   :  { %1457 = sst [smem:[#allocation17_spill]] %s1448_s4  ;;  %16 = vst [vmem:[#allocation2] sm:$0x1] %v15_v0 }
   0x3   :  { %17 = vsyncpa [#allocation4], 0 }
   0x4   :  { %19 = vsyncpa [#allocation4 + $0x1], 0 }
   0x5   :  { %20 = vsyncpa [#allocation6], 0 }
   0x6   :  { %22 = vsyncpa [#allocation6 + $0x1], 0 }
   0x7   :  { %23 = vsyncpa [#allocation9], 0  ;;  %s1241_s15 = smov 0   ;;  %s1243_s16 = smov 0  }
   0x8   :  { %s1245_s17 = smov 0   ;;  %s1247_s18 = smov 0  }
   0x9 LB: > { %1458 = sst [smem:[#allocation14_spill]] %s1172_s17  ;;  %s1265_s21 = sadd.s32 4294967295, %s1176_s18   ;;  %s1176_s18 = sphi %s1247_s18, %s1469_s18   ;;  %s1172_s17 = sphi %s1245_s17, %s1466_s17   ;;  %s1168_s16 = sphi %s1243_s16, %s1468_s16   ;;  %s1164_s15 = sphi %s1241_s15, %s1467_s15  }
   0xa   : > { %s1459_s2 = sld [smem:[#allocation16_spill]]  ;;  %p902_p0 = scmp.ge.s32.totalorder %s1176_s18, 1 }
   0xb   : > { %p50_p1 = scmp.eq.s32.totalorder %s1265_s21, 0  ;;  %p280_p2 = scmp.lt.s32.totalorder %s1176_s18, 3 }
   0xc   : > { %s1178_s23 = smov [#allocation7]   ;;  %s1461_s4 = sld [smem:[#allocation17_spill]] }
   0xd   : > { %p1270_p3 = pnand %p902_p0, %p280_p2  ;;  %s293_s24 = sshll.u32 %s1178_s23, 4  ;;  %s294_s24 = int_to_ptr.vmem [resolvable:$true] %s293_s24 }
   0xe   : > { %s1179_s28 = smov [#allocation8]   ;;  %s1180_s30 = smov 128  }
   0xf   : > { %p940_p4 = pneg %p1270_p3  ;;  %s310_s29 = sshll.u32 %s1179_s28, 4  ;;  %s311_s29 = int_to_ptr.vmem [resolvable:$true] %s310_s29 }
  0x10   : > { %s291_s20 = sshll.u32 %s1459_s2, 4  ;;  %s1181_s11 = smov 8   ;;  %s292_s20 = int_to_ptr.hbm [resolvable:$true] %s291_s20 }
  0x11   : > { %p941_p5 = pnand %p940_p4, %p50_p1  ;;  %s1282_s12 = sadd.s32 1, %s1176_s18  }
  0x12   : > { %s308_s27 = sshll.u32 %s1461_s4, 4  ;;  %s36_s13 = sadd.s32 1, %s1172_s17  ;;  %s309_s27 = int_to_ptr.hbm [resolvable:$true] %s308_s27 }
  0x13   : > { %943 = dma.hbm_to_vmem [thread:$0]  (!%p941_p5), %s292_s20, 256, %s294_s24, [#allocation6], %s1180_s30, %s1180_s30, %s1181_s11  }
  0x14   : > { %946 = dma.hbm_to_vmem [thread:$0]  (!%p941_p5), %s309_s27, 1536, %s311_s29, [#allocation9], %s1180_s30, %s1180_s30, %s1181_s11  }
  0x15   : > { %s33_s14 = ssub.s32 %s1176_s18, %s1282_s12  ;;  %p43_p6 = scmp.ne.s32.totalorder %s1172_s17, %s1168_s16 }
  0x16   : > { %p34_p7 = scmp.eq.s32.totalorder %s33_s14, 0  ;;  %p44_p8 = scmp.eq.s32.totalorder %s1176_s18, 0 }
  0x17   : > { %p49_p9 = scmp.ne.s32.totalorder %s1168_s16, %s1164_s15  ;;  %p956_p10 = scmp.lt.s32.totalorder %s1176_s18, 2 }
  0x18   : > { %s1294_s9 = scalar_select %p34_p7, %s1172_s17, %s36_s13  }
  0x19   : > { %p45_p11 = por %p44_p8, %p43_p6  ;;  %p1298_p12 = por %p50_p1, %p49_p9 }
  0x1a   : > { %1462 = sst [smem:[#allocation15_spill]] %s1294_s9  ;;  %s339_s20 = sand.u32 1, %s1172_s17  }
  0x1b   : > { %s907_s23 = sshll.u32 %s1176_s18, 3  ;;  %s906_s24 = sshll.u32 %s339_s20, 3 }
  0x1c   : > { %s347_s27 = scalar_lea.hbm %s1444_s0, %s907_s23  ;;  %s343_s29 = scalar_lea.vmem [#allocation3], %s906_s24 }
  0x1d   : > { %s349_s28 = sshll.u32 %s347_s27, 4  ;;  %s351_s15 = sshll.u32 %s343_s29, 4  ;;  %s350_s28 = int_to_ptr.hbm [resolvable:$true] %s349_s28  ;;  %s352_s15 = int_to_ptr.vmem [resolvable:$true] %s351_s15 }
  0x1e   : > { %p1309_p13 = pnand %p956_p10, %p45_p11  ;;  %s366_s14 = scalar_lea.hbm %s1445_s1, %s907_s23 }
  0x1f   : > { %s358_s2 = sand.u32 1, %s1176_s18   ;;  %s340_s4 = scalar_lea.sflag [#allocation4], %s339_s20 }
  0x20   : > { %s1070_s25 = sshra.s32 %s350_s28, 4  ;;  %p1074_p2 = pneg %p1309_p13  ;;  %s1071_s25 = int_to_ptr.hbm [resolvable:$true] %s1070_s25 }
  0x21   : > { %s1072_s26 = scalar_lea.hbm %s1071_s25, 8  ;;  %s1077_s9 = scalar_lea.hbm %s1444_s0, 16 }
  0x22   : > { %p1073_p0 = scmp.ne.s32.totalorder %s1071_s25, %s1072_s26  ;;  %p1078_p6 = scmp.lt.s32.totalorder %s1071_s25, %s1444_s0 }
  0x23   : > { %p1079_p7 = scmp.lt.s32.totalorder %s1077_s9, %s1072_s26 }
  0x24   : > { %p1075_p4 = pnand %p1074_p2, %p1073_p0 }
  0x25   : > { %p1080_p8 = por %p1079_p7, %p1078_p6 }
  0x26   : > { %p1076_p5 = pneg %p1075_p4 }
  0x28   : > { %p1081_p9 = pnand %p1080_p8, %p1076_p5 }
  0x2a   : > { %1084 = shalt.err (!%p1081_p9)
}
  0x2b   : > { %950 = dma.hbm_to_vmem [thread:$0]  (!%p1309_p13), %s350_s28, 128, %s352_s15, %s340_s4  }
  0x2c   : > { %s368_s18 = sshll.u32 %s366_s14, 4  ;;  %s362_s20 = scalar_lea.vmem [#allocation5], %s906_s24  ;;  %s369_s18 = int_to_ptr.hbm [resolvable:$true] %s368_s18 }
  0x2d   : > { %s370_s23 = sshll.u32 %s362_s20, 4  ;;  %s359_s17 = scalar_lea.sflag [#allocation6], %s358_s2  ;;  %s371_s23 = int_to_ptr.vmem [resolvable:$true] %s370_s23 }
  0x2e   : > { %s1100_s27 = sshra.s32 %s369_s18, 4  ;;  %s1107_s26 = scalar_lea.hbm %s1445_s1, 16  ;;  %s1101_s27 = int_to_ptr.hbm [resolvable:$true] %s1100_s27 }
  0x2f   : > { %s1102_s29 = scalar_lea.hbm %s1101_s27, 8  ;;  %p1108_p4 = scmp.lt.s32.totalorder %s1101_s27, %s1445_s1 }
  0x30   : > { %p1103_p10 = scmp.ne.s32.totalorder %s1101_s27, %s1102_s29  ;;  %p1109_p5 = scmp.lt.s32.totalorder %s1107_s26, %s1102_s29 }
  0x32   : > { %p1105_p11 = pnand %p1103_p10, %p1074_p2  ;;  %p1110_p6 = por %p1109_p5, %p1108_p4 }
  0x34   : > { %p1106_p0 = pneg %p1105_p11 }
  0x36   : > { %p1111_p7 = pnand %p1110_p6, %p1106_p0 }
  0x38   : > { %1114 = shalt.err (!%p1111_p7)
}
  0x39   : > { %953 = dma.hbm_to_vmem [thread:$0]  (!%p1309_p13), %s369_s18, 128, %s371_s23, %s359_s17  }
  0x3a   : > { %379 = sbr.rel (%p1270_p3) target bundleno = 1422 (0x58e), region = 60  ;;  %s381_s2 = sand.u32 (!%p1270_p3), 1, %s1168_s16  }
  0x3b   : > { %s1344_s24 = sshll.u32 (!%p1270_p3), %s381_s2, 3  ;;  %s382_s28 = scalar_lea.sflag (!%p1270_p3), [#allocation4], %s381_s2 }
  0x3c   : > { %s385_s15 = scalar_lea.vmem (!%p1270_p3), [#allocation3], %s1344_s24 }
  0x3f   : > { %1147 = dma.done.wait (%p1298_p12), %s382_s28, 128  }
  0x40   : > { %1149 = vsyncadd (%p1298_p12), %s382_s28, 4294967168  ;;  %s391_s17 = sand.u32 1, %s1265_s21   ;;  %s395_s22 = scalar_lea.vmem [#allocation5], %s1344_s24 }
  0x41   : > { %s392_s30 = scalar_lea.sflag [#allocation6], %s391_s17 }
  0x42   : > { %1151 = dma.done.wait (%p1298_p12), %s392_s30, 128  }
  0x43   : > { %1153 = vsyncadd (%p1298_p12), %s392_s30, 4294967168 }
  0x44   : > { %1155 = dma.done.wait (%p50_p1), [#allocation6], 256  }
  0x45   : > { %1157 = vsyncadd (%p50_p1), [#allocation6], 4294967040 }
  0x46   : > { %1159 = dma.done.wait (%p50_p1), [#allocation9], 1536  }
  0x47   : > { %1161 = vsyncadd (%p50_p1), [#allocation9], 4294965760  ;;  %v452_v1 = vld [vmem:[#allocation7 + $0x8] sm:$0xff]  ;;  %v451_v2 = vld [vmem:[#allocation7] sm:$0xff]  ;;  %vm457_vm0 = vcmask 130048   ;;  %vm482_vm1 = vcmask 261120  }
  0x48   : > { %475 = vmatpush.msra.mxu0 %v452_v1  ;;  %v449_v3 = vld [vmem:[%s385_s15] sm:$0xff]  ;;  %v996_v4 = vld [vmem:[%s1447_s3] ss:$0 sm:$0xff]  ;;  %v502_v13 = vld [vmem:[#allocation8] sm:$0xff]  ;;  %vm533_vm5 = vcmask 64512   ;;  %s1182_s13 = smov 96  }
  0x49   : > { %v505_v6 = vld [vmem:[#allocation8 + $0x18] sm:$0xff]  ;;  %v504_v8 = vld [vmem:[#allocation8 + $0x10] sm:$0xff]  ;;  %v503_v10 = vld [vmem:[#allocation8 + $0x8] sm:$0xff]  ;;  %p446_p1 = scmp.lt.s32.totalorder %s1265_s21, 1  ;;  %vm798_vm15 = vcmask 0  }
  0x4a   : > { %476 = vmatpush.msra.mxu0 %v451_v2  ;;  %521 = vmatpush.msra.mxu1 %v505_v6  ;;  %v1372_v28 = vld [vmem:[%s395_s22] sm:$0xff]  ;;  %v587_v30 = vld [vmem:[#allocation8 + $0x38] sm:$0xff]  ;;  %v586_v31 = vld [vmem:[#allocation8 + $0x30] sm:$0xff] }
  0x4b   : > { %915 = vmatmul.msk.f32.vlgmr.msra.gmra.mxu0 %vm457_vm0, %v449_v3  ;;  %603 = vmatpush.msra.mxu3 %v587_v30  ;;  %v585_v32 = vld [vmem:[#allocation8 + $0x28] sm:$0xff]  ;;  %v584_v33 = vld [vmem:[#allocation8 + $0x20] sm:$0xff]  ;;  %v998_v58 = vld [vmem:[%s1449_s5 + $0x1] ss:$0 sm:$0xff]  ;;  %s1471_s21 = smov (!%p446_p1, %s1265_s21), 1 }
  0x4c   : > { %522 = vmatpush.msra.mxu1 %v504_v8  ;;  %v997_v34 = vld [vmem:[%s1449_s5] ss:$0 sm:$0xff]  ;;  %v666_v63 = vld [vmem:[#allocation8 + $0x58] sm:$0xff]  ;;  %v665_v1 = vld [vmem:[#allocation8 + $0x50] sm:$0xff]  ;;  %s448_s25 = scalar_lea.vmem %s1454_s10, %s1471_s21 }
  0x4d   : > { %604 = vmatpush.msra.mxu3 %v586_v31  ;;  %682 = vmatpush.msrb.mxu0 %v666_v63  ;;  %v664_v3 = vld [vmem:[#allocation8 + $0x48] sm:$0xff]  ;;  %v663_v6 = vld [vmem:[#allocation8 + $0x40] sm:$0xff] }
  0x4e   : > { %523 = vmatpush.msra.mxu1 %v503_v10  ;;  %v742_v30 = vld [vmem:[%s1450_s6 + $0x10] sm:$0xff] }
  0x4f   : > { %605 = vmatpush.msra.mxu3 %v585_v32  ;;  %683 = vmatpush.msrb.mxu0 %v665_v1  ;;  %v741_v32 = vld [vmem:[%s1450_s6 + $0x8] sm:$0xff] }
  0x50   : > { %524 = vmatpush.msra.mxu1 %v502_v13 }
  0x51   : > { %606 = vmatpush.msra.mxu3 %v584_v33  ;;  %684 = vmatpush.msrb.mxu0 %v664_v3 }
  0x53   : > { %685 = vmatpush.msrb.mxu0 %v663_v6 }
  0xc8   : > { %v478_v5 = vpop.f32.mrf.mxu0 }
  0xc9   : > { %v479_v7 = vadd.f32 %v996_v4, %v478_v5 }
  0xcb   : > { %v481_v9 = vmul.f32 %v479_v7, %v479_v7 }
  0xcd   : > { %v483_v11 = vsel %vm482_vm1, %v481_v9, 0.0 }
  0xce   : > { %v484_v12 = vrot.slane %v483_v11, 4 }
  0xd0   : > { %v485_v14 = vadd.f32 %v484_v12, %v483_v11 }
  0xd2   : > { %v486_v15 = vrot.slane %v485_v14, 2 }
  0xd4   : > { %v487_v16 = vadd.f32 %v486_v15, %v485_v14 }
  0xd6   : > { %v488_v17 = vrot.slane %v487_v16, 1 }
  0xd8   : > { %v489_v18 = vadd.f32 %v488_v17, %v487_v16 }
  0xda   : > { %v490_v19 = vmax.f32 %v489_v18, 1e-24 }
  0xdc   : > { %1000 = vrsqrt.f32 %v490_v19  ;;  %vm497_vm3 = vweird.f32 %v490_v19 }
  0xe2   : > { %v1001_v20 = vpop.eup %1000 }
  0xe3   : > { %v492_v21 = vmul.f32 %v1001_v20, %v490_v19  ;;  %vm498_vm2 = vweird.f32 %v1001_v20 }
  0xe4   : > { %vm499_vm4 = vmor %vm497_vm3, %vm498_vm2 }
  0xe5   : > { %v493_v22 = vmul.f32 %v1001_v20, %v492_v21 }
  0xe7   : > { %v494_v23 = vmul.f32 0.5, %v493_v22  ;;  %v999_v22 = vld [vmem:[%s1449_s5 + $0x2] ss:$0 sm:$0xff] }
  0xe9   : > { %v495_v24 = vsub.f32 1.5, %v494_v23 }
  0xeb   : > { %v496_v25 = vmul.f32 %v1001_v20, %v495_v24 }
  0xed   : > { %v500_v26 = vsel %vm499_vm4, %v1001_v20, %v496_v25 }
  0xee   : > { %v501_v27 = vmul.f32 %v500_v26, %v479_v7 }
  0xf0   : > { %916 = vmatmul.msk.f32.vlgmr.msra.gmra.mxu1 %vm482_vm1, %v501_v27  ;;  %v743_v27 = vld [vmem:[%s1450_s6 + $0x18] sm:$0xff] }
  0xf1   : > { %761 = vmatpush.msrb.mxu3 %v743_v27 }
  0xf3   : > { %762 = vmatpush.msrb.mxu3 %v742_v30 }
  0xf5   : > { %763 = vmatpush.msrb.mxu3 %v741_v32 }
 0x16d   : > { %v526_v29 = vpop.f32.mrf.mxu1 }
 0x16e   : > { %530 = vrot.lane.b32.xlu0 %v526_v29, %s1182_s13  ;;  %552 = vmatpush.msra.mxu2 %v526_v29 }
 0x16f   : > { %917 = vmatmul.msk.f32.vlgmr.msra.gmra.mxu2 %vm533_vm5, %v1372_v28 }
 0x1e0   : > { %v531_v35 = vpop.permute.xlu0 %530 }
 0x1f2   : > { %v554_v36 = vpop.f32.mrf.mxu2 }
 0x1f3   : > { %v555_v37 = vadd.f32 %v554_v36, %v531_v35 }
 0x1f5   : > { %v561_v38 = vadd.f32 %v997_v34, %v555_v37  ;;  %v740_v34 = vld [vmem:[%s1450_s6] sm:$0xff] }
 0x1f6   : > { %764 = vmatpush.msrb.mxu3 %v740_v34 }
 0x1f7   : > { %v562_v39 = vmax.f32 %v561_v38, 0.0 }
 0x1f9   : > { %v563_v40 = vmul.f32 %v562_v39, %v562_v39 }
 0x1fb   : > { %v564_v41 = vsel %vm482_vm1, %v563_v40, 0.0 }
 0x1fc   : > { %v565_v42 = vrot.slane %v564_v41, 4 }
 0x1fe   : > { %v566_v43 = vadd.f32 %v565_v42, %v564_v41 }
 0x200   : > { %v567_v44 = vrot.slane %v566_v43, 2 }
 0x202   : > { %v568_v45 = vadd.f32 %v567_v44, %v566_v43 }
 0x204   : > { %v569_v46 = vrot.slane %v568_v45, 1 }
 0x206   : > { %v570_v47 = vadd.f32 %v569_v46, %v568_v45 }
 0x208   : > { %v571_v48 = vmax.f32 %v570_v47, 1e-24 }
 0x20a   : > { %1002 = vrsqrt.f32 %v571_v48  ;;  %vm578_vm7 = vweird.f32 %v571_v48 }
 0x210   : > { %v1003_v49 = vpop.eup %1002 }
 0x211   : > { %v573_v50 = vmul.f32 %v1003_v49, %v571_v48  ;;  %vm579_vm6 = vweird.f32 %v1003_v49 }
 0x212   : > { %vm580_vm8 = vmor %vm578_vm7, %vm579_vm6 }
 0x213   : > { %v574_v51 = vmul.f32 %v1003_v49, %v573_v50  ;;  %v772_v50 = vld [vmem:[%s1452_s8 + $0x10] sm:$0xff] }
 0x215   : > { %v575_v52 = vmul.f32 0.5, %v574_v51  ;;  %v771_v51 = vld [vmem:[%s1452_s8 + $0x8] sm:$0xff] }
 0x217   : > { %v576_v53 = vsub.f32 1.5, %v575_v52  ;;  %v770_v52 = vld [vmem:[%s1452_s8] sm:$0xff] }
 0x219   : > { %v577_v54 = vmul.f32 %v1003_v49, %v576_v53  ;;  %v744_v53 = vld [vmem:[%s1451_s7] sm:$0x1] }
 0x21b   : > { %v581_v55 = vsel %vm580_vm8, %v1003_v49, %v577_v54  ;;  %v773_v49 = vld [vmem:[%s1452_s8 + $0x18] sm:$0xff] }
 0x21c   : > { %v582_v56 = vmul.f32 %v581_v55, %v562_v39 }
 0x21e   : > { %918 = vmatmul.msk.f32.vlgmr.msra.gmra.mxu3 %vm482_vm1, %v582_v56 }
 0x2a1   : > { %v608_v57 = vpop.f32.mrf.mxu3 }
 0x2a2   : > { %612 = vrot.lane.b32.xlu0 %v608_v57, %s1182_s13  ;;  %630 = vmatpush.msrb.mxu2 %v608_v57  ;;  %v774_v57 = vld [vmem:[#allocation2] sm:$0x1] }
 0x2a3   : > { %919 = vmatmul.msk.f32.vlgmr.msrb.gmra.mxu2 %vm533_vm5, %v1372_v28 }
 0x2a4   : > { %790 = vmatpush.msra.mxu2 %v773_v49 }
 0x2a6   : > { %791 = vmatpush.msra.mxu2 %v772_v50 }
 0x2a8   : > { %792 = vmatpush.msra.mxu2 %v771_v51 }
 0x2aa   : > { %793 = vmatpush.msra.mxu2 %v770_v52 }
 0x314   : > { %v613_v59 = vpop.permute.xlu0 %612 }
 0x326   : > { %v632_v60 = vpop.f32.mrf.mxu2 }
 0x327   : > { %v633_v61 = vadd.f32 %v632_v60, %v613_v59 }
 0x329   : > { %v640_v62 = vadd.f32 %v998_v58, %v633_v61 }
 0x32b   : > { %v641_v0 = vmax.f32 %v640_v62, 0.0 }
 0x32d   : > { %v642_v2 = vmul.f32 %v641_v0, %v641_v0 }
 0x32f   : > { %v643_v4 = vsel %vm482_vm1, %v642_v2, 0.0 }
 0x330   : > { %v644_v5 = vrot.slane %v643_v4, 4 }
 0x332   : > { %v645_v7 = vadd.f32 %v644_v5, %v643_v4 }
 0x334   : > { %v646_v8 = vrot.slane %v645_v7, 2 }
 0x336   : > { %v647_v9 = vadd.f32 %v646_v8, %v645_v7 }
 0x338   : > { %v648_v10 = vrot.slane %v647_v9, 1 }
 0x33a   : > { %v649_v11 = vadd.f32 %v648_v10, %v647_v9 }
 0x33c   : > { %v650_v12 = vmax.f32 %v649_v11, 1e-24 }
 0x33e   : > { %1004 = vrsqrt.f32 %v650_v12  ;;  %vm657_vm10 = vweird.f32 %v650_v12 }
 0x344   : > { %v1005_v13 = vpop.eup %1004 }
 0x345   : > { %v652_v14 = vmul.f32 %v1005_v13, %v650_v12  ;;  %vm658_vm9 = vweird.f32 %v1005_v13 }
 0x346   : > { %vm659_vm11 = vmor %vm657_vm10, %vm658_vm9 }
 0x347   : > { %v653_v15 = vmul.f32 %v1005_v13, %v652_v14 }
 0x349   : > { %v654_v16 = vmul.f32 0.5, %v653_v15 }
 0x34b   : > { %v655_v17 = vsub.f32 1.5, %v654_v16 }
 0x34d   : > { %v656_v18 = vmul.f32 %v1005_v13, %v655_v17 }
 0x34f   : > { %v660_v19 = vsel %vm659_vm11, %v1005_v13, %v656_v18 }
 0x350   : > { %v661_v20 = vmul.f32 %v660_v19, %v641_v0 }
 0x352   : > { %921 = vmatmul.msk.f32.vlgmr.msrb.gmra.mxu0 %vm482_vm1, %v661_v20 }
 0x3cf   : > { %v687_v21 = vpop.f32.mrf.mxu0 }
 0x3d0   : > { %691 = vrot.lane.b32.xlu1 %v687_v21, %s1182_s13  ;;  %709 = vmatpush.msrb.mxu1 %v687_v21 }
 0x3d1   : > { %922 = vmatmul.msk.f32.vlgmr.msrb.gmra.mxu1 %vm533_vm5, %v1372_v28 }
 0x442   : > { %v692_v23 = vpop.permute.xlu1 %691 }
 0x44e   : > { %v711_v24 = vpop.f32.mrf.mxu1 }
 0x44f   : > { %v712_v25 = vadd.f32 %v711_v24, %v692_v23 }
 0x451   : > { %v719_v26 = vadd.f32 %v999_v22, %v712_v25 }
 0x453   : > { %v720_v29 = vmul.f32 %v719_v26, %v719_v26 }
 0x455   : > { %v721_v28 = vsel %vm482_vm1, %v720_v29, 0.0 }
 0x456   : > { %v722_v31 = vrot.slane %v721_v28, 4 }
 0x458   : > { %v723_v33 = vadd.f32 %v722_v31, %v721_v28 }
 0x45a   : > { %v724_v35 = vrot.slane %v723_v33, 2 }
 0x45c   : > { %v725_v36 = vadd.f32 %v724_v35, %v723_v33 }
 0x45e   : > { %v726_v37 = vrot.slane %v725_v36, 1 }
 0x460   : > { %v727_v38 = vadd.f32 %v726_v37, %v725_v36 }
 0x462   : > { %v728_v39 = vmax.f32 %v727_v38, 1e-24 }
 0x464   : > { %1006 = vrsqrt.f32 %v728_v39  ;;  %vm735_vm13 = vweird.f32 %v728_v39 }
 0x46a   : > { %v1007_v40 = vpop.eup %1006 }
 0x46b   : > { %v730_v41 = vmul.f32 %v1007_v40, %v728_v39  ;;  %vm736_vm12 = vweird.f32 %v1007_v40 }
 0x46c   : > { %vm737_vm14 = vmor %vm735_vm13, %vm736_vm12 }
 0x46d   : > { %v731_v42 = vmul.f32 %v1007_v40, %v730_v41 }
 0x46f   : > { %v732_v43 = vmul.f32 0.5, %v731_v42 }
 0x471   : > { %v733_v44 = vsub.f32 1.5, %v732_v43 }
 0x473   : > { %v734_v45 = vmul.f32 %v1007_v40, %v733_v44 }
 0x475   : > { %v738_v46 = vsel %vm737_vm14, %v1007_v40, %v734_v45 }
 0x476   : > { %v739_v47 = vmul.f32 %v738_v46, %v719_v26 }
 0x478   : > { %v746_v48 = vrot.slane %v739_v47, 7 }
 0x47a   : > { %924 = vmatmul.msk.f32.vlgmr.msrb.gmra.mxu3 %vm482_vm1, %v746_v48 }
 0x4fd   : > { %v766_v54 = vpop.f32.mrf.mxu3 }
 0x4fe   : > { %v767_v55 = vadd.f32 %v766_v54, %v744_v53 }
 0x500   : > { %1008 = vtanh.f32 %v767_v55 }
 0x506   : > { %v1009_v56 = vpop.eup %1008 }
 0x507   : > { %925 = vmatmul.msk.f32.vlgmr.msra.gmra.mxu2 %vm482_vm1, %v1009_v56 }
 0x58a   : > { %v795_v58 = vpop.f32.mrf.mxu2 }
 0x58b   : > { %v796_v59 = vadd.f32 %v795_v58, %v774_v57 }
 0x58d   : > { %799 = vst.msk [vmem:[%s448_s25] sm:$0x1] %vm798_vm15, %v796_v59 }
 0x58e PF: > { %s1465_s26 = sld [smem:[#allocation14_spill]]  ;;  %p26_p3 = scmp.ge.s32.totalorder %s1282_s12, 4  }
 0x58f   : > { %s1466_s17 = sld [smem:[#allocation15_spill]]  ;;  %s1467_s15 = smov %s1168_s16 }
 0x590   : > { %s1469_s18 = smov %s1282_s12  ;;  %28 = sbr.rel (!%p26_p3) target bundleno = 9 (0x9), region = 125 }
 0x594   : > { %s1468_s16 = smov %s1465_s26 }
 0x595   :  { %817 = vsyncpa [#allocation4], 1 }
 0x596   :  { %819 = vsyncpa [#allocation4 + $0x1], 1 }
 0x597   :  { %820 = vsyncpa [#allocation6], 1 }
 0x598   :  { %822 = vsyncpa [#allocation6 + $0x1], 1 }
 0x599   :  { %823 = vsyncpa [#allocation9], 1 }

</bundles_post_ra>
